<compile_context>
chip_gen: v6e
topology: v6e:2x2x1
jax: 0.10.0
libtpu: 0.0.40
codegen_flags: <defaults>
</compile_context>

<pallas_src>
import math

import jax
import jax.numpy as jnp
from jax.experimental import pallas as pl
from jax.experimental.pallas import tpu as pltpu

LANE = 128
SUBLANE = 8


def _round_up(n, m):
    return ((n + m - 1) // m) * m


def _pick_batch_tile(b8, cap):
    """Largest multiple-of-8 divisor of b8 that is <= cap (>= 8).

    Picking a divisor means the grid tiles the sublane-padded batch exactly
    (no large wrapper-side jnp.pad); capping at b8 // 2 (when possible)
    guarantees >= 2 grid steps so both v7x TensorCores get work.
    """
    cap = max(SUBLANE, min(cap, b8))
    if b8 >= 2 * SUBLANE:
        cap = min(cap, b8 // 2)
    tb = SUBLANE
    d = SUBLANE
    while d <= cap:
        if b8 % d == 0:
            tb = d
        d += SUBLANE
    return tb


def time_linear_kernel(t_ref, x_ref, freqs_ref,
                       w1c_ref, w1s_ref, b1_ref,
                       w2_ref, b2_ref,
                       wfc_ref, bfc_ref, out_ref):
    # --- sinusoidal timestep embedding, concat-free first projection ---
    t = t_ref[...].astype(jnp.float32)                    # (TB, 1)
    args = t * freqs_ref[...]                             # (TB, half)
    # emb = [cos(args), sin(args)]; emb @ W1 == cos@W1_cos + sin@W1_sin
    h = (jnp.dot(jnp.cos(args), w1c_ref[...], preferred_element_type=jnp.float32)
         + jnp.dot(jnp.sin(args), w1s_ref[...], preferred_element_type=jnp.float32)
         + b1_ref[...])                                    # (TB, dim_out)
    h = h * jax.nn.sigmoid(h)                              # SiLU (f32, EUP)
    alpha = (jnp.dot(h, w2_ref[...], preferred_element_type=jnp.float32)
             + b2_ref[...])                                # (TB, dim_out)

    # --- fc(x) ---
    x = x_ref[...].astype(jnp.float32)                     # in-kernel cast
    x_out = (jnp.dot(x, wfc_ref[...], preferred_element_type=jnp.float32)
             + bfc_ref[...])                               # (TB, dim_out)

    # --- modulate (compact (TB, dim_out) store) ---
    out_ref[...] = alpha * x_out


def init_params(key, dim_in, dim_out, freq_emb_size=256):
    """Deterministic synthetic parameters (PyTorch-Linear-like uniform init)."""
    half = freq_emb_size // 2
    freqs = jnp.exp(
        -math.log(10000.0) * jnp.arange(half, dtype=jnp.float32) / half
    ).reshape(1, half)

    ks = jax.random.split(key, 6)

    def lin(kw, kb, fan_in, fan_out):
        bound = 1.0 / math.sqrt(fan_in)
        w = jax.random.uniform(kw, (fan_in, fan_out), jnp.float32, -bound, bound)
        b = jax.random.uniform(kb, (1, fan_out), jnp.float32, -bound, bound)
        return w, b

    w1_t, b1 = lin(ks[0], ks[1], freq_emb_size, dim_out)   # mlp[0] (pre-transposed)
    w2_t, b2 = lin(ks[2], ks[3], dim_out, dim_out)          # mlp[2]
    wfc_t, bfc = lin(ks[4], ks[5], dim_in, dim_out)         # fc

    return dict(freqs=freqs, w1_t=w1_t, b1=b1, w2_t=w2_t, b2=b2,
                wfc_t=wfc_t, bfc=bfc)


def prepare_kernel_params(p):
    """Split W1 into cos/sin halves; keep natural (unpadded) N dimensions."""
    half = p["freqs"].shape[1]
    dim_out = p["w2_t"].shape[1]
    return dict(
        freqs=p["freqs"],                   # (1, half)
        w1_cos=p["w1_t"][:half],            # (half, dim_out)
        w1_sin=p["w1_t"][half:],            # (half, dim_out)
        b1=p["b1"],                         # (1, dim_out)
        w2=p["w2_t"],                       # (dim_out, dim_out)
        b2=p["b2"],
        wfc=p["wfc_t"],                     # (dim_in, dim_out)
        bfc=p["bfc"],
        dim_out=dim_out,
    )


def time_linear(x, t, kp, *, tile_b=1024):
    """x: (B, dim_in), t: (B,). Returns (B, dim_out) f32."""
    B, dim_in = x.shape
    dim_out = kp["dim_out"]
    half = kp["freqs"].shape[1]

    # Batch tile: multiple-of-8 divisor of the sublane-padded batch so the
    # grid tiles it exactly; capped to give >=2 grid steps when possible.
    b8 = _round_up(B, SUBLANE)
    tb = _pick_batch_tile(b8, tile_b)
    grid = (b8 // tb,)

    t2d = t.reshape(B, 1)
    if b8 != B:
        # Only the 0-7 row sublane pad; tb always divides b8 exactly.
        x_in = jnp.pad(x, ((0, b8 - B), (0, 0)))
        t2d = jnp.pad(t2d, ((0, b8 - B), (0, 0)))
    else:
        x_in = x

    def resident(shape):
        # Constant block index + single buffer: fetched once, stays resident
        # in VMEM across all grid iterations.
        return pl.BlockSpec(shape, lambda i: (0, 0),
                            pipeline_mode=pl.Buffered(1))

    out = pl.pallas_call(
        time_linear_kernel,
        out_shape=jax.ShapeDtypeStruct((b8, dim_out), jnp.float32),
        grid=grid,
        in_specs=[
            pl.BlockSpec((tb, 1), lambda i: (i, 0)),        # t
            pl.BlockSpec((tb, dim_in), lambda i: (i, 0)),   # x
            resident((1, half)),                            # freqs
            resident((half, dim_out)),                      # w1_cos
            resident((half, dim_out)),                      # w1_sin
            resident((1, dim_out)),                         # b1
            resident((dim_out, dim_out)),                   # w2
            resident((1, dim_out)),                         # b2
            resident((dim_in, dim_out)),                    # wfc
            resident((1, dim_out)),                         # bfc
        ],
        out_specs=pl.BlockSpec((tb, dim_out), lambda i: (i, 0)),
        compiler_params=pltpu.CompilerParams(
            dimension_semantics=("parallel",),              # megacore on v7x
            vmem_limit_bytes=32 * 1024 * 1024,              # safe on v5e/v6e/v7x
        ),
    )(t2d, x_in, kp["freqs"], kp["w1_cos"], kp["w1_sin"], kp["b1"],
      kp["w2"], kp["b2"], kp["wfc"], kp["bfc"])

    # Only the (rare) 0-7 row sublane pad needs slicing off.
    return out if b8 == B else out[:B]


def time_linear_ref(x, t, p):
    """Pure-JAX reference for correctness check (original params)."""
    args = t.astype(jnp.float32)[:, None] * p["freqs"]
    emb = jnp.concatenate([jnp.cos(args), jnp.sin(args)], axis=-1)
    h = emb @ p["w1_t"] + p["b1"]
    h = h * jax.nn.sigmoid(h)
    alpha = h @ p["w2_t"] + p["b2"]
    x_out = x.astype(jnp.float32) @ p["wfc_t"] + p["bfc"]
    return alpha * x_out


if __name__ == "__main__":
    dim_in, dim_out, num_timesteps = 8, 32, 1000  # num_timesteps unused in forward

    key = jax.random.PRNGKey(0)
    kp_key, kx, kt, kx2, kt2 = jax.random.split(key, 5)

    params = init_params(kp_key, dim_in, dim_out)
    kparams = prepare_kernel_params(params)

    # Primary small-shape check (single grid step, no batch pad).
    B = 8
    x = jax.random.normal(kx, (B, dim_in), jnp.float32)
    t = jax.random.randint(kt, (B,), 0, num_timesteps).astype(jnp.float32)

    out = time_linear(x, t, kparams)
    out = jax.block_until_ready(out)
    ref = time_linear_ref(x, t, params)
    assert out.shape == (B, dim_out)
    assert jnp.allclose(out, ref, atol=1e-4, rtol=1e-4), "mismatch vs reference (B=8)"

    # Secondary check: non-multiple-of-8 batch -> sublane pad + multi-step grid.
    B2 = 37
    x2 = jax.random.normal(kx2, (B2, dim_in), jnp.float32)
    t2 = jax.random.randint(kt2, (B2,), 0, num_timesteps).astype(jnp.float32)

    out2 = time_linear(x2, t2, kparams)
    out2 = jax.block_until_ready(out2)
    ref2 = time_linear_ref(x2, t2, params)
    assert out2.shape == (B2, dim_out)
    assert jnp.allclose(out2, ref2, atol=1e-4, rtol=1e-4), "mismatch vs reference (B=37)"

    print("KERNEL_OK")
</pallas_src>

<mosaic_0001>
module attributes {stable_mosaic.version = 11 : i64} {
  func.func @time_linear_kernel(%arg0: i32, %arg1: memref<8x1xf32, #tpu.memory_space<vmem>>, %arg2: memref<8x8xf32, #tpu.memory_space<vmem>>, %arg3: memref<1x128xf32, #tpu.memory_space<vmem>>, %arg4: memref<128x32xf32, #tpu.memory_space<vmem>>, %arg5: memref<128x32xf32, #tpu.memory_space<vmem>>, %arg6: memref<1x32xf32, #tpu.memory_space<vmem>>, %arg7: memref<32x32xf32, #tpu.memory_space<vmem>>, %arg8: memref<1x32xf32, #tpu.memory_space<vmem>>, %arg9: memref<8x32xf32, #tpu.memory_space<vmem>>, %arg10: memref<1x32xf32, #tpu.memory_space<vmem>>, %arg11: memref<8x32xf32, #tpu.memory_space<vmem>>) attributes {dimension_semantics = [#tpu.dimension_semantics<parallel>], iteration_bounds = array<i64: 1>, scalar_prefetch = 0 : i64, scratch_operands = 0 : i64, tpu.core_type = #tpu.core_type<tc>, window_params = [{transform_indices = @transform_0, window_bounds = array<i64: 8, 1>}, {transform_indices = @transform_1, window_bounds = array<i64: 8, 8>}, {pipeline_mode = #tpu.pipeline_mode<synchronous>, transform_indices = @transform_2, window_bounds = array<i64: 1, 128>}, {pipeline_mode = #tpu.pipeline_mode<synchronous>, transform_indices = @transform_3, window_bounds = array<i64: 128, 32>}, {pipeline_mode = #tpu.pipeline_mode<synchronous>, transform_indices = @transform_4, window_bounds = array<i64: 128, 32>}, {pipeline_mode = #tpu.pipeline_mode<synchronous>, transform_indices = @transform_5, window_bounds = array<i64: 1, 32>}, {pipeline_mode = #tpu.pipeline_mode<synchronous>, transform_indices = @transform_6, window_bounds = array<i64: 32, 32>}, {pipeline_mode = #tpu.pipeline_mode<synchronous>, transform_indices = @transform_7, window_bounds = array<i64: 1, 32>}, {pipeline_mode = #tpu.pipeline_mode<synchronous>, transform_indices = @transform_8, window_bounds = array<i64: 8, 32>}, {pipeline_mode = #tpu.pipeline_mode<synchronous>, transform_indices = @transform_9, window_bounds = array<i64: 1, 32>}, {transform_indices = @transform_10, window_bounds = array<i64: 8, 32>}]} {
    %c0 = arith.constant 0 : index
    %c0_0 = arith.constant 0 : index
    %0 = vector.load %arg1[%c0, %c0_0] : memref<8x1xf32, #tpu.memory_space<vmem>>, vector<8x1xf32>
    %c0_1 = arith.constant 0 : index
    %c0_2 = arith.constant 0 : index
    %1 = vector.load %arg3[%c0_1, %c0_2] : memref<1x128xf32, #tpu.memory_space<vmem>>, vector<1x128xf32>
    %2 = vector.broadcast %0 : vector<8x1xf32> to vector<8x128xf32>
    %3 = vector.broadcast %1 : vector<1x128xf32> to vector<8x128xf32>
    %4 = arith.mulf %2, %3 : vector<8x128xf32>
    %5 = math.cos %4 : vector<8x128xf32>
    %c0_3 = arith.constant 0 : index
    %c0_4 = arith.constant 0 : index
    %6 = vector.load %arg4[%c0_3, %c0_4] : memref<128x32xf32, #tpu.memory_space<vmem>>, vector<128x32xf32>
    %cst = arith.constant dense<0.000000e+00> : vector<8x32xf32>
    %7 = tpu.matmul %5, %6, %cst {dimension_numbers = #tpu.dot_dimension_numbers<[1], [0], [0], [1], [0, 0, 1, 1], [], []>} : vector<8x128xf32>, vector<128x32xf32>, vector<8x32xf32> -> vector<8x32xf32>
    %8 = math.sin %4 : vector<8x128xf32>
    %c0_5 = arith.constant 0 : index
    %c0_6 = arith.constant 0 : index
    %9 = vector.load %arg5[%c0_5, %c0_6] : memref<128x32xf32, #tpu.memory_space<vmem>>, vector<128x32xf32>
    %cst_7 = arith.constant dense<0.000000e+00> : vector<8x32xf32>
    %10 = tpu.matmul %8, %9, %cst_7 {dimension_numbers = #tpu.dot_dimension_numbers<[1], [0], [0], [1], [0, 0, 1, 1], [], []>} : vector<8x128xf32>, vector<128x32xf32>, vector<8x32xf32> -> vector<8x32xf32>
    %11 = arith.addf %7, %10 : vector<8x32xf32>
    %c0_8 = arith.constant 0 : index
    %c0_9 = arith.constant 0 : index
    %12 = vector.load %arg6[%c0_8, %c0_9] : memref<1x32xf32, #tpu.memory_space<vmem>>, vector<1x32xf32>
    %13 = vector.broadcast %12 : vector<1x32xf32> to vector<8x32xf32>
    %14 = arith.addf %11, %13 : vector<8x32xf32>
    %15 = arith.negf %14 : vector<8x32xf32>
    %16 = math.exp %15 : vector<8x32xf32>
    %cst_10 = arith.constant 1.000000e+00 : f32
    %17 = vector.broadcast %cst_10 : f32 to vector<8x32xf32>
    %18 = arith.addf %17, %16 : vector<8x32xf32>
    %19 = arith.divf %17, %18 : vector<8x32xf32>
    %20 = arith.mulf %14, %19 : vector<8x32xf32>
    %c0_11 = arith.constant 0 : index
    %c0_12 = arith.constant 0 : index
    %21 = vector.load %arg7[%c0_11, %c0_12] : memref<32x32xf32, #tpu.memory_space<vmem>>, vector<32x32xf32>
    %cst_13 = arith.constant dense<0.000000e+00> : vector<8x32xf32>
    %22 = tpu.matmul %20, %21, %cst_13 {dimension_numbers = #tpu.dot_dimension_numbers<[1], [0], [0], [1], [0, 0, 1, 1], [], []>} : vector<8x32xf32>, vector<32x32xf32>, vector<8x32xf32> -> vector<8x32xf32>
    %c0_14 = arith.constant 0 : index
    %c0_15 = arith.constant 0 : index
    %23 = vector.load %arg8[%c0_14, %c0_15] : memref<1x32xf32, #tpu.memory_space<vmem>>, vector<1x32xf32>
    %24 = vector.broadcast %23 : vector<1x32xf32> to vector<8x32xf32>
    %25 = arith.addf %22, %24 : vector<8x32xf32>
    %c0_16 = arith.constant 0 : index
    %c0_17 = arith.constant 0 : index
    %26 = vector.load %arg2[%c0_16, %c0_17] : memref<8x8xf32, #tpu.memory_space<vmem>>, vector<8x8xf32>
    %c0_18 = arith.constant 0 : index
    %c0_19 = arith.constant 0 : index
    %27 = vector.load %arg9[%c0_18, %c0_19] : memref<8x32xf32, #tpu.memory_space<vmem>>, vector<8x32xf32>
    %cst_20 = arith.constant dense<0.000000e+00> : vector<8x32xf32>
    %28 = tpu.matmul %26, %27, %cst_20 {dimension_numbers = #tpu.dot_dimension_numbers<[1], [0], [0], [1], [0, 0, 1, 1], [], []>} : vector<8x8xf32>, vector<8x32xf32>, vector<8x32xf32> -> vector<8x32xf32>
    %c0_21 = arith.constant 0 : index
    %c0_22 = arith.constant 0 : index
    %29 = vector.load %arg10[%c0_21, %c0_22] : memref<1x32xf32, #tpu.memory_space<vmem>>, vector<1x32xf32>
    %30 = vector.broadcast %29 : vector<1x32xf32> to vector<8x32xf32>
    %31 = arith.addf %28, %30 : vector<8x32xf32>
    %32 = arith.mulf %25, %31 : vector<8x32xf32>
    %c0_23 = arith.constant 0 : index
    %c0_24 = arith.constant 0 : index
    %33 = vector.load %arg11[%c0_23, %c0_24] : memref<8x32xf32, #tpu.memory_space<vmem>>, vector<8x32xf32>
    tpu.vector_store %arg11[%c0_23, %c0_24], %32 {strides = array<i32>} : memref<8x32xf32, #tpu.memory_space<vmem>>, vector<8x32xf32>,
    return
  }
  func.func @transform_0(%arg0: i32) -> (i32, i32) {
    %c0_i32 = arith.constant 0 : i32
    %c0_i32_0 = arith.constant 0 : i32
    return %arg0, %c0_i32 : i32, i32
  }
  func.func @transform_1(%arg0: i32) -> (i32, i32) {
    %c0_i32 = arith.constant 0 : i32
    %c0_i32_0 = arith.constant 0 : i32
    return %arg0, %c0_i32 : i32, i32
  }
  func.func @transform_2(%arg0: i32) -> (i32, i32) {
    %c0_i32 = arith.constant 0 : i32
    %c0_i32_0 = arith.constant 0 : i32
    %c0_i32_1 = arith.constant 0 : i32
    return %c0_i32, %c0_i32_0 : i32, i32
  }
  func.func @transform_3(%arg0: i32) -> (i32, i32) {
    %c0_i32 = arith.constant 0 : i32
    %c0_i32_0 = arith.constant 0 : i32
    %c0_i32_1 = arith.constant 0 : i32
    return %c0_i32, %c0_i32_0 : i32, i32
  }
  func.func @transform_4(%arg0: i32) -> (i32, i32) {
    %c0_i32 = arith.constant 0 : i32
    %c0_i32_0 = arith.constant 0 : i32
    %c0_i32_1 = arith.constant 0 : i32
    return %c0_i32, %c0_i32_0 : i32, i32
  }
  func.func @transform_5(%arg0: i32) -> (i32, i32) {
    %c0_i32 = arith.constant 0 : i32
    %c0_i32_0 = arith.constant 0 : i32
    %c0_i32_1 = arith.constant 0 : i32
    return %c0_i32, %c0_i32_0 : i32, i32
  }
  func.func @transform_6(%arg0: i32) -> (i32, i32) {
    %c0_i32 = arith.constant 0 : i32
    %c0_i32_0 = arith.constant 0 : i32
    %c0_i32_1 = arith.constant 0 : i32
    return %c0_i32, %c0_i32_0 : i32, i32
  }
  func.func @transform_7(%arg0: i32) -> (i32, i32) {
    %c0_i32 = arith.constant 0 : i32
    %c0_i32_0 = arith.constant 0 : i32
    %c0_i32_1 = arith.constant 0 : i32
    return %c0_i32, %c0_i32_0 : i32, i32
  }
  func.func @transform_8(%arg0: i32) -> (i32, i32) {
    %c0_i32 = arith.constant 0 : i32
    %c0_i32_0 = arith.constant 0 : i32
    %c0_i32_1 = arith.constant 0 : i32
    return %c0_i32, %c0_i32_0 : i32, i32
  }
  func.func @transform_9(%arg0: i32) -> (i32, i32) {
    %c0_i32 = arith.constant 0 : i32
    %c0_i32_0 = arith.constant 0 : i32
    %c0_i32_1 = arith.constant 0 : i32
    return %c0_i32, %c0_i32_0 : i32, i32
  }
  func.func @transform_10(%arg0: i32) -> (i32, i32) {
    %c0_i32 = arith.constant 0 : i32
    %c0_i32_0 = arith.constant 0 : i32
    return %arg0, %c0_i32 : i32, i32
  }
}

</mosaic_0001>

<bundles_post_ra>
// kernel: tpu_custom_call.1
= control target key start
LH: loop header
LB: loop body
LE: loop exit
PB: predicated region body
PF: predicated region fallthrough
CT: control target
= control target key end

     0   :  { %v815_v1 = vmov 0   ;;  %s1078_s0 = inlined_call_operand.vmem [shape: f32[8,1], index: 0, kind: input, shape index: {}]   ;;  %s1079_s1 = inlined_call_operand.vmem [shape: f32[8,8], index: 1, kind: input, shape index: {}]   ;;  %s1080_s2 = inlined_call_operand.vmem [shape: f32[1,128], index: 2, kind: input, shape index: {}]   ;;  %s1081_s3 = inlined_call_operand.vmem [shape: f32[128,32], index: 3, kind: input, shape index: {}]   ;;  %s1082_s4 = inlined_call_operand.vmem [shape: f32[128,32], index: 4, kind: input, shape index: {}]   ;;  %s1083_s5 = inlined_call_operand.vmem [shape: f32[1,32], index: 5, kind: input, shape index: {}]   ;;  %s1084_s6 = inlined_call_operand.vmem [shape: f32[32,32], index: 6, kind: input, shape index: {}]   ;;  %s1085_s7 = inlined_call_operand.vmem [shape: f32[1,32], index: 7, kind: input, shape index: {}]   ;;  %s1086_s8 = inlined_call_operand.vmem [shape: f32[8,32], index: 8, kind: input, shape index: {}]   ;;  %s1087_s9 = inlined_call_operand.vmem [shape: f32[1,32], index: 9, kind: input, shape index: {}]   ;;  %s1088_s10 = inlined_call_operand.hbm [shape: f32[8,32], index: 10, kind: output, shape index: {}]  }
   0x1   :  { %v36_v0 = vld [vmem:[%s1078_s0] sm:$0xff]  ;;  %784 = vset.pattern.permute.xlu0 %v815_v1 }
   0x2   :  { %40 = vperm.xlu0 %784, %v36_v0  }
   0x3   :  { %15 = vsyncpa [#allocation3], 0  ;;  %v816_v2 = vmov 0.0   ;;  %v288_v3 = vld [vmem:[%s1082_s4 + $0x78] sm:$0xff]  ;;  %v287_v5 = vld [vmem:[%s1082_s4 + $0x70] sm:$0xff]  ;;  %vm817_vm0 = vmmov 0  }
   0x4   :  { %684 = vmatprep.subr.mxu0 %v816_v2  ;;  %719 = vmatprep.subr.mxu1 %v816_v2  ;;  %v168_v4 = vld [vmem:[%s1081_s3 + $0x78] sm:$0xff]  ;;  %v167_v6 = vld [vmem:[%s1081_s3 + $0x70] sm:$0xff]  ;;  %v286_v7 = vld [vmem:[%s1082_s4 + $0x68] sm:$0xff]  ;;  %v818_v48 = vmov 683565275   ;;  %s824_s28 = smov [#allocation2]  }
   0x5   :  { %685 = vmatpush3.msra.mxu0 %v288_v3  ;;  %720 = vmatpush3.msra.mxu1 %v168_v4  ;;  %v166_v8 = vld [vmem:[%s1081_s3 + $0x68] sm:$0xff]  ;;  %v285_v9 = vld [vmem:[%s1082_s4 + $0x60] sm:$0xff]  ;;  %v284_v11 = vld [vmem:[%s1082_s4 + $0x58] sm:$0xff]  ;;  %v819_v50 = vmov 2475754826   ;;  %s620_s29 = sshll.u32 %s824_s28, 4  ;;  %s621_s29 = int_to_ptr.vmem [resolvable:$true] %s620_s29 }
   0x6   :  { %686 = vmatprep.subr.mxu0 %v816_v2  ;;  %721 = vmatprep.subr.mxu1 %v816_v2  ;;  %v165_v10 = vld [vmem:[%s1081_s3 + $0x60] sm:$0xff]  ;;  %v164_v12 = vld [vmem:[%s1081_s3 + $0x58] sm:$0xff]  ;;  %v283_v13 = vld [vmem:[%s1082_s4 + $0x50] sm:$0xff]  ;;  %v820_v53 = vmov 2131351028   ;;  %s793_s30 = scalar_lea.vmem %s621_s29, 128  ;;  %p798_p1 = scmp.lt.s32.totalorder %s621_s29, %s621_s29 }
   0x7   :  { %687 = vmatpush3.msra.mxu0 %v287_v5  ;;  %722 = vmatpush3.msra.mxu1 %v167_v6  ;;  %v163_v14 = vld [vmem:[%s1081_s3 + $0x50] sm:$0xff]  ;;  %v282_v15 = vld [vmem:[%s1082_s4 + $0x48] sm:$0xff]  ;;  %v281_v17 = vld [vmem:[%s1082_s4 + $0x40] sm:$0xff]  ;;  %v821_v56 = vmov 2102212464   ;;  %p794_p0 = scmp.ne.s32.totalorder %s621_s29, %s793_s30  ;;  %p799_p2 = scmp.lt.s32.totalorder %s793_s30, %s793_s30 }
   0x8   :  { %688 = vmatprep.subr.mxu0 %v816_v2  ;;  %723 = vmatprep.subr.mxu1 %v816_v2  ;;  %v162_v16 = vld [vmem:[%s1081_s3 + $0x48] sm:$0xff]  ;;  %v161_v18 = vld [vmem:[%s1081_s3 + $0x40] sm:$0xff]  ;;  %v280_v19 = vld [vmem:[%s1082_s4 + $0x38] sm:$0xff]  ;;  %v822_v59 = vmov 920167782  }
   0x9   :  { %689 = vmatpush3.msra.mxu0 %v286_v7  ;;  %724 = vmatpush3.msra.mxu1 %v166_v8  ;;  %v160_v20 = vld [vmem:[%s1081_s3 + $0x38] sm:$0xff]  ;;  %v279_v21 = vld [vmem:[%s1082_s4 + $0x30] sm:$0xff]  ;;  %v278_v23 = vld [vmem:[%s1082_s4 + $0x28] sm:$0xff]  ;;  %v823_v62 = vmov 1326507024   ;;  %p800_p3 = por %p799_p2, %p798_p1 }
   0xa   :  { %690 = vmatprep.subr.mxu0 %v816_v2  ;;  %725 = vmatprep.subr.mxu1 %v816_v2  ;;  %v159_v22 = vld [vmem:[%s1081_s3 + $0x30] sm:$0xff]  ;;  %v158_v24 = vld [vmem:[%s1081_s3 + $0x28] sm:$0xff]  ;;  %v277_v25 = vld [vmem:[%s1082_s4 + $0x20] sm:$0xff] }
   0xb   :  { %691 = vmatpush3.msra.mxu0 %v285_v9  ;;  %726 = vmatpush3.msra.mxu1 %v165_v10  ;;  %v157_v26 = vld [vmem:[%s1081_s3 + $0x20] sm:$0xff]  ;;  %v276_v27 = vld [vmem:[%s1082_s4 + $0x18] sm:$0xff]  ;;  %v275_v29 = vld [vmem:[%s1082_s4 + $0x10] sm:$0xff]  ;;  %p801_p4 = pnand %p800_p3, %p794_p0 }
   0xc   :  { %692 = vmatprep.subr.mxu0 %v816_v2  ;;  %727 = vmatprep.subr.mxu1 %v816_v2  ;;  %v156_v28 = vld [vmem:[%s1081_s3 + $0x18] sm:$0xff]  ;;  %v155_v30 = vld [vmem:[%s1081_s3 + $0x10] sm:$0xff]  ;;  %v274_v31 = vld [vmem:[%s1082_s4 + $0x8] sm:$0xff] }
   0xd   :  { %693 = vmatpush3.msra.mxu0 %v284_v11  ;;  %728 = vmatpush3.msra.mxu1 %v164_v12  ;;  %v154_v32 = vld [vmem:[%s1081_s3 + $0x8] sm:$0xff]  ;;  %v273_v33 = vld [vmem:[%s1082_s4] sm:$0xff] }
   0xe   :  { %694 = vmatprep.subr.mxu0 %v816_v2  ;;  %729 = vmatprep.subr.mxu1 %v816_v2  ;;  %v153_v34 = vld [vmem:[%s1081_s3] sm:$0xff] }
   0xf   :  { %695 = vmatpush3.msra.mxu0 %v283_v13  ;;  %730 = vmatpush3.msra.mxu1 %v163_v14  ;;  %v628_v35 = vld [vmem:[%s1080_s2] ss:$0 sm:$0xff] }
  0x10   :  { %696 = vmatprep.subr.mxu0 %v816_v2  ;;  %731 = vmatprep.subr.mxu1 %v816_v2 }
  0x11   :  { %697 = vmatpush3.msra.mxu0 %v282_v15  ;;  %732 = vmatpush3.msra.mxu1 %v162_v16 }
  0x12   :  { %698 = vmatprep.subr.mxu0 %v816_v2  ;;  %733 = vmatprep.subr.mxu1 %v816_v2 }
  0x13   :  { %699 = vmatpush3.msra.mxu0 %v281_v17  ;;  %734 = vmatpush3.msra.mxu1 %v161_v18 }
  0x14   :  { %700 = vmatprep.subr.mxu0 %v816_v2  ;;  %735 = vmatprep.subr.mxu1 %v816_v2 }
  0x15   :  { %701 = vmatpush3.msra.mxu0 %v280_v19  ;;  %736 = vmatpush3.msra.mxu1 %v160_v20 }
  0x16   :  { %702 = vmatprep.subr.mxu0 %v816_v2  ;;  %737 = vmatprep.subr.mxu1 %v816_v2 }
  0x17   :  { %703 = vmatpush3.msra.mxu0 %v279_v21  ;;  %738 = vmatpush3.msra.mxu1 %v159_v22 }
  0x18   :  { %704 = vmatprep.subr.mxu0 %v816_v2  ;;  %739 = vmatprep.subr.mxu1 %v816_v2 }
  0x19   :  { %705 = vmatpush3.msra.mxu0 %v278_v23  ;;  %740 = vmatpush3.msra.mxu1 %v158_v24 }
  0x1a   :  { %706 = vmatprep.subr.mxu0 %v816_v2  ;;  %741 = vmatprep.subr.mxu1 %v816_v2 }
  0x1b   :  { %707 = vmatpush3.msra.mxu0 %v277_v25  ;;  %742 = vmatpush3.msra.mxu1 %v157_v26 }
  0x1c   :  { %708 = vmatprep.subr.mxu0 %v816_v2  ;;  %743 = vmatprep.subr.mxu1 %v816_v2 }
  0x1d   :  { %709 = vmatpush3.msra.mxu0 %v276_v27  ;;  %744 = vmatpush3.msra.mxu1 %v156_v28 }
  0x1e   :  { %710 = vmatprep.subr.mxu0 %v816_v2  ;;  %745 = vmatprep.subr.mxu1 %v816_v2 }
  0x1f   :  { %711 = vmatpush3.msra.mxu0 %v275_v29  ;;  %746 = vmatpush3.msra.mxu1 %v155_v30 }
  0x20   :  { %712 = vmatprep.subr.mxu0 %v816_v2  ;;  %747 = vmatprep.subr.mxu1 %v816_v2 }
  0x21   :  { %713 = vmatpush3.msra.mxu0 %v274_v31  ;;  %748 = vmatpush3.msra.mxu1 %v154_v32 }
  0x22   :  { %714 = vmatprep.subr.mxu0 %v816_v2  ;;  %749 = vmatprep.subr.mxu1 %v816_v2 }
  0x23   :  { %715 = vmatpush3.msra.mxu0 %v273_v33  ;;  %716 = vmatprep.mubr.msk.f32.mxu0 %vm817_vm0, %v816_v2 }
  0x24   :  { %750 = vmatpush3.msra.mxu1 %v153_v34  ;;  %751 = vmatprep.mubr.msk.f32.mxu1 %vm817_vm0, %v816_v2 }
  0x25   :  { %754 = vmatprep.subr.mxu0 %v816_v2  ;;  %765 = vmatprep.subr.mxu1 %v816_v2 }
  0x7d   :  { %v41_v36 = vpop.permute.xlu0 %40 }
  0x7e   :  { %v1020_v37 = vmul.f32 %v628_v35, %v41_v36 }
  0x80   :  { %v53_v38 = vand.u32 2139095040, %v1020_v37  ;;  %v50_v42 = vand.u32 2147483647, %v1020_v37  ;;  %vm52_vm8 = vcmp.lt.s32.totalorder %v1020_v37, 0 }
  0x82   :  { %v54_v39 = vshrl.u32 %v53_v38, 23  ;;  %v57_v45 = vand.u32 8388607, %v50_v42  ;;  %vm51_vm9 = vcmp.le.f32.partialorder %v50_v42, 0.7853982 }
  0x84   :  { %v629_v40 = vadd.s32 4294967169, %v54_v39  ;;  %v58_v0 = vor.u32 8388608, %v57_v45 }
  0x86   :  { %v60_v41 = vadd.s32 1, %v629_v40  ;;  %v98_v15 = vshll.u32 %v58_v0, 8 }
  0x88   :  { %vm61_vm1 = vcmp.gt.s32.totalorder %v60_v41, 0 }
  0x89   :  { %v62_v43 = vsel %vm61_vm1, %v60_v41, 0  ;;  %vm142_vm1 = vweird.f32 %v1020_v37 }
  0x8a   :  { %v64_v44 = vand.u32 31, %v62_v43  ;;  %v63_v47 = vshrl.u32 %v62_v43, 5 }
  0x8c   :  { %v65_v46 = vsub.s32 32, %v64_v44  ;;  %v67_v49 = vshll.u32 %v818_v48, %v64_v44  ;;  %v70_v51 = vshll.u32 %v819_v50, %v64_v44  ;;  %v73_v55 = vshll.u32 %v820_v53, %v64_v44 }
  0x8d   :  { %v76_v58 = vshll.u32 %v821_v56, %v64_v44  ;;  %v79_v61 = vshll.u32 %v822_v59, %v64_v44  ;;  %vm82_vm2 = vcmp.lt.s32.totalorder %v63_v47, 1  ;;  %vm85_vm3 = vcmp.lt.s32.totalorder %v63_v47, 4 }
  0x8e   :  { %v68_v52 = vshrl.u32 %v819_v50, %v65_v46  ;;  %v71_v54 = vshrl.u32 %v820_v53, %v65_v46  ;;  %v74_v57 = vshrl.u32 %v821_v56, %v65_v46  ;;  %v77_v60 = vshrl.u32 %v822_v59, %v65_v46 }
  0x8f   :  { %v80_v63 = vshrl.u32 %v823_v62, %v65_v46  ;;  %v66_v10 = vshrl.u32 %v818_v48, %v65_v46  ;;  %vm84_vm4 = vcmp.lt.s32.totalorder %v63_v47, 3  ;;  %vm83_vm5 = vcmp.lt.s32.totalorder %v63_v47, 2 }
  0x90   :  { %v69_v1 = vor.u32 %v68_v52, %v67_v49  ;;  %v72_v3 = vor.u32 %v71_v54, %v70_v51  ;;  %v75_v4 = vor.u32 %v74_v57, %v73_v55  ;;  %v78_v5 = vor.u32 %v77_v60, %v76_v58 }
  0x91   :  { %v81_v6 = vor.u32 %v80_v63, %v79_v61 }
  0x92   :  { %v87_v7 = vsel %vm85_vm3, %v75_v4, 2102212464  ;;  %v90_v8 = vsel %vm82_vm2, %v69_v1, %v72_v3  ;;  %v94_v9 = vsel %vm82_vm2, %v72_v3, %v75_v4  ;;  %v91_v11 = vsel %vm85_vm3, %v78_v5, 920167782 }
  0x93   :  { %v95_v12 = vsel %vm85_vm3, %v81_v6, 1326507024  ;;  %v92_v13 = vsel %vm84_vm4, %v75_v4, %v91_v11  ;;  %v86_v16 = vsel %vm82_vm2, %v66_v10, %v69_v1  ;;  %v88_v17 = vsel %vm84_vm4, %v72_v3, %v87_v7  ;;  %v530_v10 = vld [vmem:[%s1086_s8] sm:$0xff]  ;;  %v445_v11 = vld [vmem:[%s1084_s6 + $0x8] sm:$0xff] }
  0x94   :  { %v96_v14 = vsel %vm84_vm4, %v78_v5, %v95_v12  ;;  %v93_v18 = vsel %vm83_vm5, %v90_v8, %v92_v13  ;;  %v89_v24 = vsel %vm83_vm5, %v86_v16, %v88_v17  ;;  %v529_v12 = vld [vmem:[%s1079_s1] sm:$0xff]  ;;  %vm455_vm2 = vcmask 261120  }
  0x95   :  { %v97_v19 = vsel %vm83_vm5, %v94_v9, %v96_v14  ;;  %v1029_v22 = vmul.u32.u64.low %v98_v15, %v93_v18  ;;  %v1030_v23 = vmul.u32.u64.high %v98_v15, %v93_v18, %v1029_v22  ;;  %v105_v26 = vmul.u32 %v98_v15, %v89_v24  ;;  %v447_v9 = vld [vmem:[%s1084_s6 + $0x18] sm:$0xff]  ;;  %v444_v13 = vld [vmem:[%s1084_s6] sm:$0xff] }
  0x96   :  { %v1026_v20 = vmul.u32.u64.low %v98_v15, %v97_v19  ;;  %v1027_v21 = vmul.u32.u64.high %v98_v15, %v97_v19, %v1026_v20  ;;  %v637_v16 = vld [vmem:[%s1083_s5] ss:$0 sm:$0xff] }
  0x97   :  { %v108_v25 = vadd.s32 1, %v1030_v23 }
  0x98   :  { %vm107_vm6 = vc.u32 %v1027_v21, %v1029_v22  ;;  %v106_v39 = vadd.s32 %v1029_v22, %v1027_v21 }
  0x99   :  { %v109_v27 = vsel %vm107_vm6, %v108_v25, %v1030_v23 }
  0x9a   :  { %v110_v28 = vadd.s32 %v109_v27, %v105_v26  ;;  %v641_v27 = vld [vmem:[%s1087_s9] ss:$0 sm:$0xff] }
  0x9c   :  { %v111_v29 = vadd.s32 536870912, %v110_v28 }
  0x9e   :  { %v112_v30 = vshrl.u32 %v111_v29, 30 }
  0xa0   :  { %v113_v31 = vshll.u32 %v112_v30, 30  ;;  %v136_v53 = vsub.s32 4, %v112_v30 }
  0xa2   :  { %v114_v32 = vsub.s32 %v110_v28, %v113_v31  ;;  %v137_v56 = vsel %vm52_vm8, %v136_v53, %v112_v30  ;;  %v639_v28 = vld [vmem:[%s1085_s7] ss:$0 sm:$0xff] }
  0xa3   :  { %v139_v57 = vsel %vm51_vm9, 0, %v137_v56 }
  0xa4   :  { %v116_v33 = vsub.s32 0, %v114_v32  ;;  %v262_v58 = vadd.s32 3, %v139_v57  ;;  %v143_v60 = vand.u32 3, %v139_v57 }
  0xa6   :  { %v630_v34 = vmin.u32 %v116_v33, %v114_v32  ;;  %v263_v59 = vand.u32 3, %v262_v58  ;;  %vm148_vm11 = vcmp.eq.s32.totalorder %v143_v60, 2  ;;  %vm145_vm13 = vcmp.eq.s32.totalorder %v143_v60, 0 }
  0xa7   :  { %vm144_vm15 = vcmp.lt.s32.totalorder %v143_v60, 2 }
  0xa8   :  { %v118_v35 = vclz %v630_v34  ;;  %vm268_vm10 = vcmp.eq.s32.totalorder %v263_v59, 2  ;;  %vm265_vm12 = vcmp.eq.s32.totalorder %v263_v59, 0  ;;  %vm264_vm14 = vcmp.lt.s32.totalorder %v263_v59, 2 }
  0xaa   :  { %v631_v36 = vadd.s32 4294967294, %v118_v35 }
  0xac   :  { %vm632_vm7 = vcmp.lt.s32.totalorder %v631_v36, 0 }
  0xad   :  { %v121_v38 = vsel %vm632_vm7, 0, %v631_v36 }
  0xae   :  { %v122_v40 = vsub.s32 32, %v121_v38  ;;  %v126_v41 = vsub.s32 4294967266, %v121_v38  ;;  %v123_v43 = vshll.u32 %v114_v32, %v121_v38 }
  0xb0   :  { %v124_v44 = vshrl.u32 %v106_v39, %v122_v40  ;;  %v127_v45 = vadd.s32 127, %v126_v41 }
  0xb2   :  { %v125_v46 = vor.u32 %v124_v44, %v123_v43  ;;  %v128_v47 = vshll.u32 %v127_v45, 23 }
  0xb4   :  { %v129_v48 = vor.u32 4788187, %v128_v47  ;;  %v132_v50 = vcvt.s32.f32 %v125_v46 }
  0xb6   :  { %v130_v49 = vand.u32 2147483647, %v129_v48 }
  0xb8   :  { %v133_v51 = vmul.f32 %v132_v50, %v130_v49 }
  0xba   :  { %v134_v52 = vxor.u32 2147483648, %v133_v51 }
  0xbc   :  { %v135_v54 = vsel %vm52_vm8, %v134_v52, %v133_v51 }
  0xbd   :  { %v138_v55 = vsel %vm51_vm9, %v1020_v37, %v135_v54  ;;  %v446_v37 = vld [vmem:[%s1084_s6 + $0x10] sm:$0xff] }
  0xbe   :  { %785 = vcosq.f32 %v138_v55 }
  0xbf   :  { %787 = vsinq.f32 %v138_v55 }
  0xcb   :  { %v786_v61 = vpop.eup %785 }
  0xcc   :  { %v788_v62 = vpop.eup %787  ;;  %v149_v63 = vxor.u32 2147483648, %v786_v61 }
  0xcd   :  { %v146_v0 = vxor.u32 2147483648, %v788_v62 }
  0xce   :  { %v270_v1 = vsel %vm268_vm10, %v149_v63, %v788_v62  ;;  %v150_v3 = vsel %vm148_vm11, %v149_v63, %v788_v62 }
  0xcf   :  { %v267_v42 = vsel %vm265_vm12, %v786_v61, %v146_v0  ;;  %v147_v4 = vsel %vm145_vm13, %v786_v61, %v146_v0 }
  0xd0   :  { %v271_v5 = vsel %vm264_vm14, %v267_v42, %v270_v1  ;;  %v151_v6 = vsel %vm144_vm15, %v147_v4, %v150_v3 }
  0xd1   :  { %v272_v7 = vsel %vm142_vm1, nan, %v271_v5  ;;  %v152_v8 = vsel %vm142_vm1, nan, %v151_v6 }
  0xd2   :  { %717 = vmatmul.mubr.f32.vlgmr.msra.gmra.mxu0 %v272_v7  ;;  %752 = vmatmul.mubr.f32.vlgmr.msra.gmra.mxu1 %v152_v8 }
  0xd3   :  { %767 = vmatprep.mubr.msk.f32.mxu1 %vm817_vm0, %v816_v2  ;;  %762 = vmatprep.mubr.msk.f32.mxu0 %vm817_vm0, %v816_v2  ;;  %vm538_vm0 = vcmask 64512  }
  0xd4   :  { %755 = vmatpush3.msra.mxu0 %v447_v9  ;;  %766 = vmatpush3.msra.mxu1 %v530_v10 }
  0xd5   :  { %756 = vmatprep.subr.mxu0 %v816_v2 }
  0xd6   :  { %757 = vmatpush3.msra.mxu0 %v446_v37  ;;  %768 = vmatmul.mubr.msk.f32.vlgmr.msra.gmra.mxu1 %vm538_vm0, %v529_v12 }
  0xd7   :  { %758 = vmatprep.subr.mxu0 %v816_v2 }
  0xd8   :  { %759 = vmatpush3.msra.mxu0 %v445_v11 }
  0xd9   :  { %760 = vmatprep.subr.mxu0 %v816_v2 }
  0xda   :  { %761 = vmatpush3.msra.mxu0 %v444_v13 }
 0x192   :  { %v355_v14 = vpop.f32.mrf.mxu0  ;;  %v425_v15 = vpop.f32.mrf.mxu1 }
 0x193   :  { %v426_v17 = vadd.f32 %v425_v15, %v355_v14 }
 0x194   :  { %v718_v18 = vpop.f32.mrf.mxu0  ;;  %v753_v19 = vpop.f32.mrf.mxu1 }
 0x195   :  { %v436_v20 = vadd.f32 %v637_v16, %v426_v17 }
 0x196   :  { %v608_v25 = vpop.f32.mrf.mxu1 }
 0x197   :  { %v638_v21 = vmul.f32 -1.442695, %v436_v20  ;;  %v609_v29 = vadd.f32 %v641_v27, %v608_v25 }
 0x198   :  { %v769_v26 = vpop.f32.mrf.mxu1 }
 0x199   :  { %789 = vpow2.f32 %v638_v21 }
 0x1a6   :  { %v790_v22 = vpop.eup %789 }
 0x1a7   :  { %v440_v23 = vadd.f32 1.0, %v790_v22 }
 0x1a9   :  { %791 = vrcp.f32 %v440_v23 }
 0x1b6   :  { %v792_v24 = vpop.eup %791 }
 0x1b7   :  { %v443_v2 = vmul.f32 %v792_v24, %v436_v20 }
 0x1b9   :  { %763 = vmatmul.mubr.msk.f32.vlgmr.msra.gmra.mxu0 %vm455_vm2, %v443_v2 }
 0x279   :  { %v525_v30 = vpop.f32.mrf.mxu0 }
 0x27a   :  { %v526_v31 = vadd.f32 %v639_v28, %v525_v30 }
 0x27b   :  { %v764_v32 = vpop.f32.mrf.mxu0 }
 0x27c   :  { %v612_v33 = vmul.f32 %v609_v29, %v526_v31 }
 0x27e   :  { %613 = vst.msk [vmem:[#allocation2] sm:$0xff] %vm455_vm2, %v612_v33 }
 0x27f   :  { %804 = shalt.err (!%p801_p4)
}
 0x280   :  { %623 = dma.vmem_to_hbm [thread:$0]  %s621_s29, 128, %s1088_s10, [#allocation3]  }
 0x281   :  { %813 = dma.done.wait [#allocation3], 128  }
 0x282   :  { %814 = vsyncadd [#allocation3], 4294967168 }
 0x283   :  { %627 = vsyncpa [#allocation3], 1 }

</bundles_post_ra>
